<compile_context>
chip_gen: v7x
topology: tpu7x:2x2x1
jax: 0.10.0
libtpu: 0.0.40
codegen_flags: <defaults>
</compile_context>

<pallas_src>
import jax
import jax.numpy as jnp
from jax.experimental import pallas as pl
from jax.experimental.pallas import tpu as pltpu

_LANE = 128


def _round_up(v, m):
    return ((v + m - 1) // m) * m


def _largest_aligned_divisor(n, step, cap):
    """Largest d with d % step == 0, n % d == 0 and d <= cap (falls back to step)."""
    cand = min(n, max(step, (cap // step) * step))
    while cand >= step:
        if n % cand == 0:
            return cand
        cand -= step
    return step


def _budgets():
    """(per-x-tile byte budget, scoped VMEM limit) chosen per TPU generation."""
    tile_budget = 4 << 20      # safe default for v7x (64 MiB VMEM per TensorCore)
    vmem_limit = 32 << 20
    try:
        info = pltpu.get_tpu_info()
        vmem_cap = getattr(info, "vmem_capacity_bytes", 0) or 0
        if vmem_cap >= (100 << 20):      # v5e / v6e: 128 MiB physical VMEM
            tile_budget = 8 << 20
            vmem_limit = 64 << 20
    except Exception:
        pass                             # non-TPU host / interpret mode: keep defaults
    return tile_budget, vmem_limit


def _choose_tiles(C, S, itemsize, tile_budget):
    """Pick (tc, ts, C_pad, S_pad) honoring the (8,128) rule and the byte budget."""
    # dtype-aware sublane granularity: 8 rows f32, 16 bf16/f16, 32 int8/fp8.
    sub_mult = 8 * max(1, 4 // itemsize)
    max_tile_elems = max(_LANE * sub_mult, tile_budget // itemsize)

    S_pad = _round_up(S, _LANE)
    # Spatial tile: leave room for at least min(C, sub_mult) channel rows so the
    # channel tile never blows past the byte budget.
    ts_cap = max(_LANE, max_tile_elems // max(1, min(C, sub_mult)))
    ts = _largest_aligned_divisor(S_pad, _LANE, ts_cap)

    # Channel tile: as many channels as fit next to one spatial tile.
    tc_cap = max(1, max_tile_elems // ts)
    if C <= tc_cap:
        tc, C_pad = C, C                 # full channel dim -> always layout-legal
    else:
        C_pad = _round_up(C, sub_mult)
        tc = _largest_aligned_divisor(C_pad, sub_mult, tc_cap)
    return tc, ts, C_pad, S_pad


def _make_kernel(tc, grid_c):
    def kernel(x_ref, n_ref, w_ref, o_ref):
        # x_ref/o_ref: (1, tc, ts); n_ref: (1, 1, ts); w_ref: (C_pad, 1) f32 resident.
        if grid_c == 1:
            w = w_ref[...]                                   # whole weight block
        else:
            c0 = pl.multiple_of(pl.program_id(2) * tc, tc)   # aligned sublane slice
            w = w_ref[pl.ds(c0, tc), :]                      # (tc, 1)
        x = x_ref[...].astype(jnp.float32)
        n = n_ref[...].astype(jnp.float32)
        o_ref[...] = (x + w[None, :, :] * n).astype(o_ref.dtype)
    return kernel


def noise_injection(x, weight, noise=None, *, key=None):
    """JAX/Pallas equivalent of NoiseInjection.forward.

    x:      (B, C, H, W)
    weight: (1, C, 1, 1)  (kept in f32 for the multiply; result cast to x.dtype)
    noise:  optional (B, 1, H, W); if None it is drawn ~N(0, 1) host-side.
    """
    B, C, H, W = x.shape
    S = H * W

    if noise is None:
        if key is None:
            key = jax.random.PRNGKey(0)
        noise = jax.random.normal(key, (B, 1, H, W), dtype=jnp.float32)

    x2 = x.reshape(B, C, S)                              # lane-dense layout
    n2 = noise.reshape(B, 1, S)
    w2 = weight.reshape(C, 1).astype(jnp.float32)

    tile_budget, vmem_limit = _budgets()
    itemsize = jnp.dtype(x.dtype).itemsize
    tc, ts, C_pad, S_pad = _choose_tiles(C, S, itemsize, tile_budget)

    if S_pad != S or C_pad != C:
        # Pad so every block is lane/sublane aligned (unmasked stores); padded
        # region is sliced off after the call.
        x2 = jnp.pad(x2, ((0, 0), (0, C_pad - C), (0, S_pad - S)))
        n2 = jnp.pad(n2, ((0, 0), (0, 0), (0, S_pad - S)))
        w2 = jnp.pad(w2, ((0, C_pad - C), (0, 0)))

    grid_s = S_pad // ts
    grid_c = C_pad // tc

    # Largest independent axis goes outermost for a balanced 2-TensorCore (v7x)
    # split; channel stays innermost so the shared noise block is reused
    # (no re-DMA) across channel blocks.
    if grid_s > B:
        grid = (grid_s, B, grid_c)
        xmap = lambda s, b, c: (b, c, s)
        nmap = lambda s, b, c: (b, 0, s)
    else:
        grid = (B, grid_s, grid_c)
        xmap = lambda b, s, c: (b, c, s)
        nmap = lambda b, s, c: (b, 0, s)
    wmap = lambda *_: (0, 0)                             # resident: DMA'd once

    out = pl.pallas_call(
        _make_kernel(tc, grid_c),
        out_shape=jax.ShapeDtypeStruct((B, C_pad, S_pad), x.dtype),
        grid_spec=pltpu.PrefetchScalarGridSpec(
            num_scalar_prefetch=0,
            grid=grid,
            in_specs=[
                pl.BlockSpec((1, tc, ts), xmap),         # x tile
                pl.BlockSpec((1, 1, ts), nmap),          # shared noise tile
                pl.BlockSpec((C_pad, 1), wmap),          # full weight, loaded once
            ],
            out_specs=pl.BlockSpec((1, tc, ts), xmap),
        ),
        compiler_params=pltpu.CompilerParams(
            dimension_semantics=("parallel", "parallel", "parallel"),
            vmem_limit_bytes=vmem_limit,
        ),
    )(x2, n2, w2)

    if S_pad != S or C_pad != C:
        out = out[:, :C, :S]
    return out.reshape(B, C, H, W)


if __name__ == "__main__":
    B, C, H, W = 2, 4, 16, 16

    key = jax.random.PRNGKey(0)
    kx, knoise, kw, krng = jax.random.split(key, 4)

    x = jax.random.normal(kx, (B, C, H, W), dtype=jnp.float32)
    noise = jax.random.normal(knoise, (B, 1, H, W), dtype=jnp.float32)

    # The PyTorch module initializes weight = zeros(1, C, 1, 1). Use a
    # deterministic non-zero weight so the compute path is actually exercised.
    weight = jax.random.normal(kw, (1, C, 1, 1), dtype=jnp.float32) * 0.1

    # Explicit-noise path: exact match against the plain-JAX reference.
    out = jax.block_until_ready(noise_injection(x, weight, noise))
    ref = x + weight * noise
    assert out.shape == (B, C, H, W)
    assert jnp.allclose(out, ref, atol=1e-6, rtol=1e-6), "mismatch vs reference"

    # noise=None path: noise drawn host-side ~N(0,1), broadcast over channels.
    weight2 = jnp.full((1, C, 1, 1), 0.5, dtype=jnp.float32)
    out2 = jax.block_until_ready(noise_injection(x, weight2, noise=None, key=krng))
    assert out2.shape == (B, C, H, W)
    assert bool(jnp.all(jnp.isfinite(out2)))
    # Recover the injected noise; it must be identical across channels (the
    # (B, 1, H, W) broadcast of the module) and roughly unit-scale.
    recovered = (out2 - x) / 0.5
    assert jnp.allclose(recovered, recovered[:, :1], atol=1e-5, rtol=1e-5), \
        "noise not broadcast across channels"
    n_std = float(jnp.std(recovered))
    assert 0.2 < n_std < 5.0, f"noise scale looks wrong: std={n_std}"

    print("KERNEL_OK")
</pallas_src>

<mosaic_0001>
module attributes {stable_mosaic.version = 11 : i64} {
  func.func @kernel(%arg0: i32, %arg1: i32, %arg2: i32, %arg3: memref<1x4x256xf32, #tpu.memory_space<vmem>>, %arg4: memref<1x1x256xf32, #tpu.memory_space<vmem>>, %arg5: memref<4x1xf32, #tpu.memory_space<vmem>>, %arg6: memref<1x4x256xf32, #tpu.memory_space<vmem>>) attributes {dimension_semantics = [#tpu.dimension_semantics<parallel>, #tpu.dimension_semantics<parallel>, #tpu.dimension_semantics<parallel>], iteration_bounds = array<i64: 2, 1, 1>, scalar_prefetch = 0 : i64, scratch_operands = 0 : i64, tpu.core_type = #tpu.core_type<tc>, window_params = [{transform_indices = @transform_0, window_bounds = array<i64: 1, 4, 256>}, {transform_indices = @transform_1, window_bounds = array<i64: 1, 1, 256>}, {pipeline_mode = #tpu.pipeline_mode<synchronous>, transform_indices = @transform_2, window_bounds = array<i64: 4, 1>}, {transform_indices = @transform_3, window_bounds = array<i64: 1, 4, 256>}]} {
    %c0 = arith.constant 0 : index
    %c0_0 = arith.constant 0 : index
    %0 = vector.load %arg5[%c0, %c0_0] : memref<4x1xf32, #tpu.memory_space<vmem>>, vector<4x1xf32>
    %c0_1 = arith.constant 0 : index
    %c0_2 = arith.constant 0 : index
    %c0_3 = arith.constant 0 : index
    %1 = vector.load %arg3[%c0_1, %c0_2, %c0_3] : memref<1x4x256xf32, #tpu.memory_space<vmem>>, vector<1x4x256xf32>
    %c0_4 = arith.constant 0 : index
    %c0_5 = arith.constant 0 : index
    %c0_6 = arith.constant 0 : index
    %2 = vector.load %arg4[%c0_4, %c0_5, %c0_6] : memref<1x1x256xf32, #tpu.memory_space<vmem>>, vector<1x1x256xf32>
    %3 = vector.shape_cast %0 : vector<4x1xf32> to vector<1x4x1xf32>
    %4 = vector.broadcast %3 : vector<1x4x1xf32> to vector<1x4x256xf32>
    %5 = vector.broadcast %2 : vector<1x1x256xf32> to vector<1x4x256xf32>
    %6 = arith.mulf %4, %5 : vector<1x4x256xf32>
    %7 = arith.addf %1, %6 : vector<1x4x256xf32>
    %c0_7 = arith.constant 0 : index
    %c0_8 = arith.constant 0 : index
    %c0_9 = arith.constant 0 : index
    %8 = vector.load %arg6[%c0_7, %c0_8, %c0_9] : memref<1x4x256xf32, #tpu.memory_space<vmem>>, vector<1x4x256xf32>
    tpu.vector_store %arg6[%c0_7, %c0_8, %c0_9], %7 {strides = array<i32>} : memref<1x4x256xf32, #tpu.memory_space<vmem>>, vector<1x4x256xf32>,
    return
  }
  func.func @transform_0(%arg0: i32, %arg1: i32, %arg2: i32) -> (i32, i32, i32) {
    %c0_i32 = arith.constant 0 : i32
    return %arg0, %arg2, %arg1 : i32, i32, i32
  }
  func.func @transform_1(%arg0: i32, %arg1: i32, %arg2: i32) -> (i32, i32, i32) {
    %c0_i32 = arith.constant 0 : i32
    %c0_i32_0 = arith.constant 0 : i32
    return %arg0, %c0_i32, %arg1 : i32, i32, i32
  }
  func.func @transform_2(%arg0: i32, %arg1: i32, %arg2: i32) -> (i32, i32) {
    %c0_i32 = arith.constant 0 : i32
    %c0_i32_0 = arith.constant 0 : i32
    %c0_i32_1 = arith.constant 0 : i32
    return %c0_i32, %c0_i32_0 : i32, i32
  }
  func.func @transform_3(%arg0: i32, %arg1: i32, %arg2: i32) -> (i32, i32, i32) {
    %c0_i32 = arith.constant 0 : i32
    return %arg0, %arg2, %arg1 : i32, i32, i32
  }
}

</mosaic_0001>

<bundles_post_ra>
// kernel: tpu_custom_call.1
= control target key start
LH: loop header
LB: loop body
LE: loop exit
PB: predicated region body
PF: predicated region fallthrough
CT: control target
= control target key end

     0   :  { %8 = vsyncpa [#allocation3], 0  ;;  %s804_s0 = inlined_call_operand.hbm [shape: f32[2,4,256], index: 0, kind: input, shape index: {}]   ;;  %s805_s1 = inlined_call_operand.vmem [shape: f32[2,1,256], index: 1, kind: input, shape index: {}]   ;;  %s806_s2 = inlined_call_operand.vmem [shape: f32[4,1], index: 2, kind: input, shape index: {}]   ;;  %s807_s3 = inlined_call_operand.hbm [shape: f32[2,4,256], index: 3, kind: output, shape index: {}]  }
   0x1   :  { %10 = vsyncpa [#allocation3 + $0x1], 0 }
   0x2   :  { %11 = vsyncpa [#allocation4], 0 }
   0x3   :  { %13 = vsyncpa [#allocation4 + $0x1], 0  ;;  %s624_s12 = smov 0   ;;  %s626_s13 = smov 0  }
   0x4   :  { %s628_s14 = smov 0   ;;  %s630_s15 = smov 0  }
   0x5   :  { %s632_s16 = smov 0   ;;  %s634_s17 = smov 0  }
   0x6 LB: > { %s405_s18 = sadd.s32 4294967295, %s599_s17   ;;  %s406_s19 = sadd.s32 4294967294, %s599_s17   ;;  %s599_s17 = sphi %s634_s17, %s19_s17   ;;  %s595_s16 = sphi %s632_s16, %s823_s16   ;;  %s591_s15 = sphi %s630_s15, %s822_s15   ;;  %s587_s14 = sphi %s628_s14, %s821_s14   ;;  %s583_s13 = sphi %s626_s13, %s820_s13   ;;  %s579_s12 = sphi %s624_s12, %s819_s12  }
   0x7   : > { %s38_s20 = sadd.s32 1, %s595_s16  ;;  %s49_s21 = sadd.s32 1, %s587_s14 }
   0x8   : > { %p40_p0 = scmp.ge.s32.totalorder %s38_s20, 2  ;;  %p56_p1 = scmp.ne.s32.totalorder %s587_s14, %s583_s13 }
   0x9   : > { %p57_p2 = scmp.eq.s32.totalorder %s599_s17, 0  ;;  %p62_p3 = scmp.ne.s32.totalorder %s583_s13, %s579_s12 }
   0xa   : > { %s825_s20 = smov (%p40_p0, %s38_s20), 0  ;;  %p63_p5 = scmp.eq.s32.totalorder %s405_s18, 0 }
   0xb   : > { %p665_p4 = por %p57_p2, %p56_p1  ;;  %s42_s23 = ssub.s32 %s595_s16, %s825_s20 }
   0xc   : > { %p139_p6 = scmp.eq.s32.totalorder %s405_s18, 1  ;;  %p47_p7 = scmp.eq.s32.totalorder %s42_s23, 0 }
   0xd   : > { %p671_p8 = por %p63_p5, %p62_p3  ;;  %p145_p10 = scmp.eq.s32.totalorder %s406_s19, 1 }
   0xe   : > { %p675_p9 = por %p139_p6, %p56_p1  ;;  %p435_p13 = scmp.lt.s32.totalorder %s599_s17, 2 }
   0xf   : > { %s680_s26 = scalar_select %p47_p7, %s587_s14, %s49_s21  }
  0x10   : > { %s811_s25 = scalar_select %p675_p9, 1, 0 }
  0x11   : > { %p682_p11 = por %p145_p10, %p62_p3  ;;  %s168_s28 = sand.u32 1, %s587_s14  }
  0x12   : > { %s409_s29 = sshll.u32 %s168_s28, 3  ;;  %s421_s30 = sshll.u32 %s595_s16, 7 }
  0x13   : > { %s812_s27 = scalar_select %p682_p11, 1, 0 }
  0x14   : > { %s693_s6 = scalar_lea.hbm %s804_s0, %s421_s30  ;;  %s172_s7 = scalar_lea.vmem [#allocation2], %s409_s29 }
  0x15   : > { %s184_s8 = sshll.u32 %s172_s7, 4  ;;  %p699_p0 = pnand %p435_p13, %p665_p4  ;;  %s695_s8 = int_to_ptr.vmem [resolvable:$true] %s184_s8 }
  0x16   : > { %s169_s10 = scalar_lea.sflag [#allocation3], %s168_s28  ;;  %s487_s11 = scalar_lea.hbm %s693_s6, 128 }
  0x17   : > { %p488_p3 = scmp.ne.s32.totalorder %s693_s6, %s487_s11  ;;  %p489_p5 = pneg %p699_p0 }
  0x18   : > { %s492_s21 = scalar_lea.hbm %s804_s0, 256  ;;  %p493_p4 = scmp.lt.u32.totalorder %s693_s6, %s804_s0 }
  0x19   : > { %p490_p6 = pnand %p489_p5, %p488_p3  ;;  %p494_p10 = scmp.lt.u32.totalorder %s492_s21, %s487_s11 }
  0x1a   : > { %p496_p12 = scmp.lt.u32.totalorder %s487_s11, %s693_s6 }
  0x1b   : > { %p491_p7 = pneg %p490_p6  ;;  %p495_p13 = por %p494_p10, %p493_p4 }
  0x1d   : > { %p497_p1 = por %p496_p12, %p495_p13 }
  0x1f   : > { %p498_p2 = pnand %p497_p1, %p491_p7 }
  0x21   : > { %501 = shalt.err (!%p498_p2)
}
  0x22   : > { %s502_s28 = scalar_lea.vmem %s695_s8, 128  ;;  %s601_s29 = smov [#allocation2]  }
  0x23   : > { %p503_p3 = scmp.ne.s32.totalorder %s695_s8, %s502_s28  ;;  %s507_s30 = sshll.u32 %s601_s29, 4  ;;  %s508_s30 = int_to_ptr.vmem [resolvable:$false] %s507_s30 }
  0x24   : > { %s509_s4 = scalar_lea.vmem %s508_s30, 256  ;;  %p510_p9 = scmp.lt.s32.totalorder %s695_s8, %s508_s30 }
  0x25   : > { %p505_p6 = pnand %p503_p3, %p489_p5  ;;  %p511_p4 = scmp.lt.s32.totalorder %s509_s4, %s502_s28 }
  0x27   : > { %p506_p11 = pneg %p505_p6  ;;  %p512_p10 = por %p511_p4, %p510_p9 }
  0x29   : > { %p513_p12 = pnand %p512_p10, %p506_p11 }
  0x2b   : > { %516 = shalt.err (!%p513_p12)
}
  0x2c   : > { %430 = dma.hbm_to_vmem [thread:$0]  (!%p699_p0), %s693_s6, 128, %s695_s8, %s169_s10  }
  0x2d   : > { %p814_p1 = scmp.lt.s32.totalorder %s599_s17, 3  ;;  %p815_p2 = scmp.ge.s32.totalorder %s599_s17, 1 }
  0x2f   : > { %p202_p5 = pnand %p815_p2, %p814_p1 }
  0x30   : > { %s735_s5 = sand.u32 (!%p202_p5), 1, %s583_s13  }
  0x31   : > { %205 = sbr.rel (%p202_p5) target bundleno = 207 (0xcf), region = 32  ;;  %s413_s7 = sshll.u32 (!%p202_p5), %s735_s5, 3 }
  0x32   : > { %s208_s11 = scalar_lea.sflag (!%p202_p5), [#allocation3], %s735_s5  ;;  %s211_s18 = scalar_lea.vmem (!%p202_p5), [#allocation2], %s413_s7 }
  0x38   : > { %570 = dma.done.wait (%p671_p8), %s208_s11, 128  }
  0x39   : > { %572 = vsyncadd (%p671_p8), %s208_s11, 4294967168  ;;  %v602_v0 = vmov 0   ;;  %v253_v1 = vld [vmem:[%s806_s2] sm:$0xf]  ;;  %p244_p9 = scmp.lt.s32.totalorder %s591_s15, 1  ;;  %v262_v2 = vlaneseq  ;;  %s422_s22 = sshll.u32 %s591_s15, 7 }
  0x3a   : > { %486 = vset.pattern.permute.xlu0 %v602_v0  ;;  %v254_v12 = vld [vmem:[%s211_s18] sm:$0xff]  ;;  %s241_s23 = scalar_lea.vmem [#allocation5], %s413_s7  ;;  %s755_s4 = scalar_lea.hbm %s807_s3, %s422_s22 }
  0x3b   : > { %258 = vperm.xlu0 %486, %v253_v1   ;;  %s245_s9 = scalar_select %p244_p9, %s591_s15, 1  ;;  %v263_v3 = vshrl.u32 %v262_v2, 7 }
  0x3c   : > { %s299_s28 = sshll.u32 %s241_s23, 4  ;;  %s281_s11 = scalar_lea.sflag [#allocation4], %s735_s5  ;;  %s757_s28 = int_to_ptr.vmem [resolvable:$true] %s299_s28 }
  0x3d   : > { %s415_s10 = sshll.u32 %s245_s9, 1  ;;  %v264_v4 = vsub.s32 0, %v263_v3  ;;  %v268_v5 = vsub.s32 1, %v263_v3  ;;  %s517_s6 = scalar_lea.vmem %s757_s28, 128 }
  0x3e   : > { %s250_s24 = scalar_lea.vmem %s805_s1, %s415_s10  ;;  %p518_p8 = scmp.ne.s32.totalorder %s757_s28, %s517_s6 }
  0x3f   : > { %v255_v6 = vld [vmem:[%s250_s24] sm:$0x3]  ;;  %p816_p11 = scmp.ne.s32.totalorder %s811_s25, 0  ;;  %s603_s15 = smov [#allocation5]  }
  0x40   : > { %v265_v7 = vrot.slane %v255_v6, %v264_v4  ;;  %v269_v8 = vrot.slane %v255_v6, %v268_v5  ;;  %s521_s7 = sshll.u32 %s603_s15, 4  ;;  %s522_s7 = int_to_ptr.vmem [resolvable:$false] %s521_s7 }
  0x41   : > { %p519_p0 = pnand %p518_p8, %p816_p11  ;;  %s523_s18 = scalar_lea.vmem %s522_s7, 256 }
  0x42   : > { %p524_p13 = scmp.lt.s32.totalorder %s757_s28, %s522_s7  ;;  %p525_p3 = scmp.lt.s32.totalorder %s523_s18, %s517_s6 }
  0x43   : > { %p520_p7 = pneg %p519_p0 }
  0x44   : > { %p526_p6 = por %p525_p3, %p524_p13 }
  0x46   : > { %p527_p4 = pnand %p526_p6, %p520_p7 }
  0xba   : > { %v259_v9 = vpop.permute.xlu0 %258 }
  0xbb   : > { %v272_v10 = vmul.f32 %v265_v7, %v259_v9  ;;  %v273_v11 = vmul.f32 %v269_v8, %v259_v9 }
  0xbd   : > { %v276_v13 = vcombine.low %v272_v10, %v273_v11 }
  0xbf   : > { %v278_v14 = vadd.f32 %v276_v13, %v254_v12 }
  0xc1   : > { %279 = vst [vmem:[%s241_s23] sm:$0xff] %v278_v14 }
  0xc2   : > { %530 = shalt.err (!%p527_p4)
}
  0xc3   : > { %s531_s5 = scalar_lea.hbm %s755_s4, 128  ;;  %s535_s10 = scalar_lea.hbm %s807_s3, 256 }
  0xc4   : > { %p532_p10 = scmp.ne.s32.totalorder %s755_s4, %s531_s5  ;;  %p536_p2 = scmp.lt.u32.totalorder %s755_s4, %s807_s3 }
  0xc5   : > { %p537_p5 = scmp.lt.u32.totalorder %s535_s10, %s531_s5  ;;  %p539_p8 = scmp.lt.u32.totalorder %s531_s5, %s755_s4 }
  0xc6   : > { %p533_p12 = pnand %p532_p10, %p816_p11 }
  0xc7   : > { %p538_p9 = por %p537_p5, %p536_p2 }
  0xc8   : > { %p534_p1 = pneg %p533_p12 }
  0xc9   : > { %p540_p0 = por %p539_p8, %p538_p9 }
  0xcb   : > { %p541_p7 = pnand %p540_p0, %p534_p1 }
  0xcd   : > { %544 = shalt.err (!%p541_p7)
}
  0xce   : > { %425 = dma.vmem_to_hbm [thread:$0]  (%p816_p11), %s757_s28, 128, %s755_s4, %s281_s11  }
  0xcf PF: > { %s311_s24 = sand.u32 1, %s579_s12   ;;  %p817_p13 = scmp.ne.s32.totalorder %s812_s27, 0 }
  0xd0   : > { %p818_p3 = scmp.ge.s32.totalorder %s599_s17, 2  ;;  %s312_s22 = scalar_lea.sflag [#allocation4], %s311_s24 }
  0xd2   : > { %p432_p6 = pnand %p818_p3, %p817_p13 }
  0xd4   : > { %574 = dma.done.wait (!%p432_p6), %s312_s22, 128  }
  0xd5   : > { %576 = vsyncadd (!%p432_p6), %s312_s22, 4294967168  ;;  %s19_s17 = sadd.s32 1, %s599_s17   ;;  %s819_s12 = smov %s583_s13 }
  0xd6   : > { %p16_p4 = scmp.ge.s32.totalorder %s19_s17, 4   ;;  %s820_s13 = smov %s587_s14 }
  0xd7   : > { %s821_s14 = smov %s680_s26  ;;  %s822_s15 = smov %s595_s16 }
  0xd8   : > { %s823_s16 = smov %s825_s20  ;;  %18 = sbr.rel (!%p16_p4) target bundleno = 6 (0x6), region = 80 }
  0xdf   :  { %317 = vsyncpa [#allocation3], 1 }
  0xe0   :  { %319 = vsyncpa [#allocation3 + $0x1], 1 }
  0xe1   :  { %320 = vsyncpa [#allocation4], 1 }
  0xe2   :  { %322 = vsyncpa [#allocation4 + $0x1], 1 }

</bundles_post_ra>
